<compile_context>
chip_gen: v7x
topology: tpu7x:2x2x1
jax: 0.10.0
libtpu: 0.0.40
codegen_flags: <defaults>
</compile_context>

<pallas_src>
import functools

import numpy as np
import jax
import jax.numpy as jnp
from jax import lax
from jax.experimental import pallas as pl
from jax.experimental.pallas import tpu as pltpu

LANE = 128
# Explicit scoped-VMEM budget (comfortably above the 16/32 MiB defaults,
# below every generation's physical VMEM, incl. v7x's 64 MiB).
_VMEM_LIMIT_BYTES = 48 * 1024 * 1024


# --------------------------------------------------------------------------
# small helpers
# --------------------------------------------------------------------------

def _round_up(n, m=LANE):
    return ((n + m - 1) // m) * m


def _pad_dim(a, axis, target):
    cur = a.shape[axis]
    if cur == target:
        return a
    cfg = [(0, 0)] * a.ndim
    cfg[axis] = (0, target - cur)
    return jnp.pad(a, cfg)


def _movavg(s, K, dil):
    """Mimics F.conv1d(scr, ones(1,1,K)/K, dilation=dil) on (B, L) -> (B, L_out)."""
    L = s.shape[1]
    Lo = L - (K - 1) * dil
    acc = jnp.zeros((s.shape[0], Lo), s.dtype)
    for k in range(K):
        acc = acc + s[:, k * dil:k * dil + Lo]
    return acc / K


def _pad_and_dilations(fw):
    """Exactly mirrors the PyTorch __init__ bookkeeping."""
    pad = [fw[0] // 2]
    dil = fw[0]
    conv_dils = []
    for i in range(1, len(fw)):
        pad.append((fw[i] - 1) * dil // 2)
        conv_dils.append(dil)      # dilation baked into layers_conv[2*(i-1)]
        dil *= fw[i]
    return pad, conv_dils


# --------------------------------------------------------------------------
# kernel 1: generic conv + scale/shift (+ReLU, +scr)   (expand / fallback shrink)
# --------------------------------------------------------------------------

def _conv_kernel(x_ref, w_ref, scale_ref, shift_ref, *rest,
                 K, dil, L_out, has_scr, apply_relu, mxu_dtype):
    scr_ref = rest[0] if has_scr else None
    o_ref = rest[1] if has_scr else rest[0]

    # im2col: one lane-aligned concat of the K dilated slices, one MXU matmul.
    if K == 1:
        xi = x_ref[0].astype(mxu_dtype)
    else:
        xi = jnp.concatenate(
            [x_ref[0, pl.ds(k * dil, L_out), :] for k in range(K)],
            axis=-1).astype(mxu_dtype)
    y = jnp.dot(xi, w_ref[...], preferred_element_type=jnp.float32)

    y = y * scale_ref[...] + shift_ref[...]              # folded BN (or bias)
    if apply_relu:
        y = jnp.maximum(y, 0.0)
    if has_scr:
        y = y * scr_ref[0]                               # (L_out, 1) broadcast
    o_ref[0] = y.astype(o_ref.dtype)


def fused_conv1d(x, w, scale, shift, *, K, dil=1, scr=None, relu=True,
                 mxu_dtype=jnp.float32):
    """Valid dilated conv1d + scale/shift (+ReLU, +scr mul), channels pre-padded.

    x: (B, L_in, C_in_p);  w: (K*C_in_p, C_out_p);  scale/shift: (C_out_p,)
    scr: (B, L_out, 1) or None;  returns (B, L_out, C_out_p).
    """
    B, L_in, C_in_p = x.shape
    KC, C_out_p = w.shape
    assert KC == K * C_in_p
    L_out = L_in - (K - 1) * dil

    in_specs = [
        pl.BlockSpec((1, L_in, C_in_p), lambda b: (b, 0, 0)),
        pl.BlockSpec((KC, C_out_p), lambda b: (0, 0)),
        pl.BlockSpec((1, C_out_p), lambda b: (0, 0)),
        pl.BlockSpec((1, C_out_p), lambda b: (0, 0)),
    ]
    args = [x, w, scale.reshape(1, -1), shift.reshape(1, -1)]
    if scr is not None:
        assert scr.shape == (B, L_out, 1)
        in_specs.append(pl.BlockSpec((1, L_out, 1), lambda b: (b, 0, 0)))
        args.append(scr)

    kernel = functools.partial(
        _conv_kernel, K=K, dil=dil, L_out=L_out,
        has_scr=scr is not None, apply_relu=relu, mxu_dtype=mxu_dtype)

    return pl.pallas_call(
        kernel,
        out_shape=jax.ShapeDtypeStruct((B, L_out, C_out_p), x.dtype),
        grid=(B,),
        in_specs=in_specs,
        out_specs=pl.BlockSpec((1, L_out, C_out_p), lambda b: (b, 0, 0)),
        compiler_params=pltpu.CompilerParams(
            dimension_semantics=("parallel",),
            vmem_limit_bytes=_VMEM_LIMIT_BYTES),
    )(*args)


# --------------------------------------------------------------------------
# kernel 2: fused residual block
#   dilated conv -> BN -> ReLU -> *scr   (intermediate held in VMEM scratch)
#   -> 1x1 conv -> BN -> ReLU -> + residual (read from x_ref at offset `pad`)
#   [-> optional fused shrink 1x1 conv + bias]
# --------------------------------------------------------------------------

def _resblock_kernel(x_ref, w1_ref, s1_ref, b1_ref, scr_ref,
                     w2_ref, s2_ref, b2_ref, *rest,
                     K, dil, L_mid, res_off, has_shrink, mxu_dtype):
    if has_shrink:
        w3_ref, b3_ref, o_ref, h_scr = rest
    else:
        o_ref, h_scr = rest

    # ---- dilated conv (im2col, single matmul) + BN + ReLU + scr ----
    xi = jnp.concatenate(
        [x_ref[0, pl.ds(k * dil, L_mid), :] for k in range(K)],
        axis=-1).astype(mxu_dtype)
    h = jnp.dot(xi, w1_ref[...], preferred_element_type=jnp.float32)
    h = jnp.maximum(h * s1_ref[...] + b1_ref[...], 0.0) * scr_ref[0]
    h_scr[...] = h.astype(mxu_dtype)            # stays in VMEM, never hits HBM

    # ---- 1x1 conv + BN + ReLU + residual (residual read straight from x_ref) ----
    y = jnp.dot(h_scr[...], w2_ref[...], preferred_element_type=jnp.float32)
    y = jnp.maximum(y * s2_ref[...] + b2_ref[...], 0.0)
    y = y + x_ref[0, pl.ds(res_off, L_mid), :]

    if has_shrink:
        z = jnp.dot(y.astype(mxu_dtype), w3_ref[...],
                    preferred_element_type=jnp.float32) + b3_ref[...]
        o_ref[0] = z.astype(o_ref.dtype)
    else:
        o_ref[0] = y.astype(o_ref.dtype)


def fused_residual_block(x, scr, w_dil, s_dil, b_dil, w_1x1, s_1x1, b_1x1,
                         *, K, dil, shrink_w=None, shrink_b=None,
                         mxu_dtype=jnp.float32):
    """One whole residual block (optionally + fused shrink) in a single kernel.

    x: (B, L_in, C_p);  scr: (B, L_mid, 1);  w_dil: (K*C_p, C_p);
    w_1x1: (C_p, C_p);  shrink_w: (C_p, C_out_p) or None.
    """
    B, L_in, C_p = x.shape
    L_mid = L_in - (K - 1) * dil
    res_off = (K - 1) * dil // 2                 # == pad[i+1] (non-causal)
    assert scr.shape == (B, L_mid, 1)

    has_shrink = shrink_w is not None
    C_out_p = shrink_w.shape[-1] if has_shrink else C_p

    in_specs = [
        pl.BlockSpec((1, L_in, C_p), lambda b: (b, 0, 0)),
        pl.BlockSpec((K * C_p, C_p), lambda b: (0, 0)),
        pl.BlockSpec((1, C_p), lambda b: (0, 0)),
        pl.BlockSpec((1, C_p), lambda b: (0, 0)),
        pl.BlockSpec((1, L_mid, 1), lambda b: (b, 0, 0)),
        pl.BlockSpec((C_p, C_p), lambda b: (0, 0)),
        pl.BlockSpec((1, C_p), lambda b: (0, 0)),
        pl.BlockSpec((1, C_p), lambda b: (0, 0)),
    ]
    args = [x, w_dil, s_dil.reshape(1, -1), b_dil.reshape(1, -1),
            scr, w_1x1, s_1x1.reshape(1, -1), b_1x1.reshape(1, -1)]
    if has_shrink:
        in_specs += [pl.BlockSpec((C_p, C_out_p), lambda b: (0, 0)),
                     pl.BlockSpec((1, C_out_p), lambda b: (0, 0))]
        args += [shrink_w, shrink_b.reshape(1, -1)]

    kernel = functools.partial(
        _resblock_kernel, K=K, dil=dil, L_mid=L_mid, res_off=res_off,
        has_shrink=has_shrink, mxu_dtype=mxu_dtype)

    return pl.pallas_call(
        kernel,
        out_shape=jax.ShapeDtypeStruct((B, L_mid, C_out_p), x.dtype),
        grid=(B,),
        in_specs=in_specs,
        out_specs=pl.BlockSpec((1, L_mid, C_out_p), lambda b: (b, 0, 0)),
        scratch_shapes=[pltpu.VMEM((L_mid, C_p), mxu_dtype)],
        compiler_params=pltpu.CompilerParams(
            dimension_semantics=("parallel",),
            vmem_limit_bytes=_VMEM_LIMIT_BYTES),
    )(*args)


# --------------------------------------------------------------------------
# parameter preparation: pad channel dims to multiples of 128 (lane-dense),
# reshape weights to (K*C_in_p, C_out_p), cast weights to the MXU dtype.
# Padded weight rows/cols and padded shifts are zero, so padded lanes stay
# exactly zero through BN/ReLU/scr/residual and never contaminate downstream.
# --------------------------------------------------------------------------

def prepare_params(params, mxu_dtype=jnp.float32):
    C = params['expand_w'].shape[-1]
    COUT = params['shrink_w'].shape[-1]
    C_p, COUT_p = _round_up(C), _round_up(COUT)

    def pad_w(w):                       # (K, Ci, Co) -> (K*Ci_p, Co_p)
        K, Ci, Co = w.shape
        Ci_p, Co_p = _round_up(Ci), _round_up(Co)
        w = _pad_dim(_pad_dim(w, 1, Ci_p), 2, Co_p)
        return w.reshape(K * Ci_p, Co_p).astype(mxu_dtype)

    def pad_vec(v, target, fill):
        v = v.astype(jnp.float32)
        if v.shape[0] == target:
            return v
        return jnp.concatenate(
            [v, jnp.full((target - v.shape[0],), fill, jnp.float32)])

    p = {
        'num_joints_out': params['num_joints_out'],
        'COUT': COUT,
        'expand_w': pad_w(params['expand_w']),
        'expand_scale': pad_vec(params['expand_scale'], C_p, 1.0),
        'expand_shift': pad_vec(params['expand_shift'], C_p, 0.0),
        'shrink_w': pad_w(params['shrink_w']),
        'shrink_b': pad_vec(params['shrink_b'], COUT_p, 0.0),
        'blocks': [],
    }
    for blk in params['blocks']:
        p['blocks'].append({
            'w_dil': pad_w(blk['w_dil']),
            'scale_dil': pad_vec(blk['scale_dil'], C_p, 1.0),
            'shift_dil': pad_vec(blk['shift_dil'], C_p, 0.0),
            'w_1x1': pad_w(blk['w_1x1']),
            'scale_1x1': pad_vec(blk['scale_1x1'], C_p, 1.0),
            'shift_1x1': pad_vec(blk['shift_1x1'], C_p, 0.0),
        })
    return p


# --------------------------------------------------------------------------
# full forward pass (eval mode)
# --------------------------------------------------------------------------

def conf_temporal_model_v2_forward(x, params, filter_widths,
                                   mxu_dtype=jnp.float32):
    """x: (B, T, num_joints_in, in_features); last feature is the confidence."""
    fw = filter_widths
    B, T, J, F = x.shape

    pp = prepare_params(params, mxu_dtype)
    num_joints_out = pp['num_joints_out']
    COUT = pp['COUT']

    scr = jnp.mean(x[..., -1], axis=-1)                   # (B, T)
    h = x[..., :-1].reshape(B, T, J * (F - 1)).astype(jnp.float32)
    h = _pad_dim(h, 2, _round_up(h.shape[-1]))            # lane-pad input chans

    pad, conv_dils = _pad_and_dilations(fw)

    # scr = F.conv1d(scr, ones/fw0) + 1e-6
    scr = _movavg(scr, fw[0], 1) + 1e-6
    # x = drop(relu(expand_bn(expand_conv(x))) * scr)   (dropout == identity, eval)
    h = fused_conv1d(h, pp['expand_w'], pp['expand_scale'], pp['expand_shift'],
                     K=fw[0], dil=1, scr=scr[..., None], relu=True,
                     mxu_dtype=mxu_dtype)

    n_blocks = len(pad) - 1
    next_dil = fw[0]
    for i in range(n_blocks):
        # NOTE: scr uses fw[i] (not fw[i+1]) and next_dil *= fw[i] — PyTorch
        # reference quirk kept verbatim; do not "fix".
        scr = _movavg(scr, fw[i], next_dil) + 1e-6
        blk = pp['blocks'][i]
        is_last = (i == n_blocks - 1)
        h = fused_residual_block(
            h, scr[..., None],
            blk['w_dil'], blk['scale_dil'], blk['shift_dil'],
            blk['w_1x1'], blk['scale_1x1'], blk['shift_1x1'],
            K=fw[i + 1], dil=conv_dils[i],
            shrink_w=pp['shrink_w'] if is_last else None,
            shrink_b=pp['shrink_b'] if is_last else None,
            mxu_dtype=mxu_dtype)
        next_dil *= fw[i]

    if n_blocks == 0:
        # single-layer model: shrink applied directly after expand
        ones = jnp.ones((pp['shrink_w'].shape[-1],), jnp.float32)
        h = fused_conv1d(h, pp['shrink_w'], ones, pp['shrink_b'],
                         K=1, dil=1, relu=False, mxu_dtype=mxu_dtype)

    out = h[..., :COUT]                                    # drop padded lanes
    return out.reshape(B, -1, num_joints_out, 3)


# --------------------------------------------------------------------------
# deterministic parameter init (eval-mode BN folded to scale/shift)
# --------------------------------------------------------------------------

def init_params(key, num_joints_in, num_joints_out, filter_widths, channels):
    fw = filter_widths
    eps = 1e-5
    keys = iter(jax.random.split(key, 128))

    def nrm(shape, s=0.1):
        return s * jax.random.normal(next(keys), shape, jnp.float32)

    def bn_fold(C):
        gamma = 1.0 + nrm((C,))
        beta = nrm((C,))
        running_mean = nrm((C,))
        running_var = 1.0 + jnp.abs(nrm((C,)))
        scale = gamma / jnp.sqrt(running_var + eps)
        shift = beta - running_mean * scale
        return scale, shift

    C = channels
    params = {'num_joints_out': num_joints_out}
    params['expand_w'] = nrm((fw[0], num_joints_in * 2, C))   # (K, C_in, C_out)
    params['expand_scale'], params['expand_shift'] = bn_fold(C)
    blocks = []
    for i in range(1, len(fw)):
        blk = {}
        blk['w_dil'] = nrm((fw[i], C, C))
        blk['scale_dil'], blk['shift_dil'] = bn_fold(C)
        blk['w_1x1'] = nrm((1, C, C))
        blk['scale_1x1'], blk['shift_1x1'] = bn_fold(C)
        blocks.append(blk)
    params['blocks'] = blocks
    params['shrink_w'] = nrm((1, C, num_joints_out * 3))
    params['shrink_b'] = nrm((num_joints_out * 3,))
    return params


# --------------------------------------------------------------------------
# pure-JAX reference (NCT layout, mirrors the PyTorch forward exactly)
# --------------------------------------------------------------------------

def reference_forward(x, params, filter_widths):
    fw = filter_widths
    B, T, J, F = x.shape

    def conv1d(xn, w_kio, dil=1):
        w = jnp.transpose(w_kio, (2, 1, 0))              # (K,Ci,Co) -> OIK
        return lax.conv_general_dilated(
            xn, w, (1,), 'VALID', rhs_dilation=(dil,),
            dimension_numbers=('NCH', 'OIH', 'NCH'),
            precision=lax.Precision.HIGHEST)

    def bn(xn, scale, shift):
        return xn * scale[None, :, None] + shift[None, :, None]

    scr = jnp.mean(x[..., -1], axis=-1)[:, None, :]      # (B,1,T)
    h = jnp.transpose(x[..., :-1].reshape(B, T, J * (F - 1)), (0, 2, 1))

    pad, conv_dils = _pad_and_dilations(fw)

    scr = conv1d(scr, jnp.ones((fw[0], 1, 1), jnp.float32) / fw[0]) + 1e-6
    h = jax.nn.relu(bn(conv1d(h, params['expand_w']),
                       params['expand_scale'], params['expand_shift'])) * scr

    next_dil = fw[0]
    for i in range(len(pad) - 1):
        p = pad[i + 1]
        res = h[:, :, p:h.shape[2] - p]
        scr = conv1d(scr, jnp.ones((fw[i], 1, 1), jnp.float32) / fw[i],
                     dil=next_dil) + 1e-6
        blk = params['blocks'][i]
        h = jax.nn.relu(bn(conv1d(h, blk['w_dil'], dil=conv_dils[i]),
                           blk['scale_dil'], blk['shift_dil'])) * scr
        h = res + jax.nn.relu(bn(conv1d(h, blk['w_1x1']),
                                 blk['scale_1x1'], blk['shift_1x1']))
        next_dil *= fw[i]

    h = conv1d(h, params['shrink_w']) + params['shrink_b'][None, :, None]
    h = jnp.transpose(h, (0, 2, 1))
    return h.reshape(B, -1, params['num_joints_out'], 3)


if __name__ == "__main__":
    key = jax.random.PRNGKey(0)
    kp, kx = jax.random.split(key)

    B, T = 2, 16
    num_joints_in, num_joints_out = 4, 4
    in_features = 3            # 2D coords + confidence channel
    filter_widths = (3, 3)     # receptive field = 9 <= T
    channels = 32

    params = init_params(kp, num_joints_in, num_joints_out, filter_widths, channels)
    x = jax.random.normal(kx, (B, T, num_joints_in, in_features), jnp.float32)

    ref = reference_forward(x, params, filter_widths)

    # f32 MXU path — tight tolerance against the HIGHEST-precision reference.
    out_f32 = jax.block_until_ready(
        conf_temporal_model_v2_forward(x, params, filter_widths,
                                       mxu_dtype=jnp.float32))
    assert out_f32.shape == ref.shape, (out_f32.shape, ref.shape)
    np.testing.assert_allclose(np.asarray(out_f32), np.asarray(ref),
                               rtol=1e-3, atol=1e-3)

    # bf16 MXU path (production setting: half the weight DMA bytes, full MXU
    # throughput on v6e/v7x) — f32 accumulate/epilogue, looser tolerance.
    out_bf16 = jax.block_until_ready(
        conf_temporal_model_v2_forward(x, params, filter_widths,
                                       mxu_dtype=jnp.bfloat16))
    assert out_bf16.shape == ref.shape
    np.testing.assert_allclose(np.asarray(out_bf16), np.asarray(ref),
                               rtol=5e-2, atol=5e-2)

    print("KERNEL_OK")
</pallas_src>

<mosaic_0001>
module attributes {stable_mosaic.version = 11 : i64} {
  func.func @_conv_kernel(%arg0: i32, %arg1: memref<1x16x128xf32, #tpu.memory_space<vmem>>, %arg2: memref<384x128xf32, #tpu.memory_space<vmem>>, %arg3: memref<1x128xf32, #tpu.memory_space<vmem>>, %arg4: memref<1x128xf32, #tpu.memory_space<vmem>>, %arg5: memref<1x14x1xf32, #tpu.memory_space<vmem>>, %arg6: memref<1x14x128xf32, #tpu.memory_space<vmem>>) attributes {dimension_semantics = [#tpu.dimension_semantics<parallel>], iteration_bounds = array<i64: 2>, scalar_prefetch = 0 : i64, scratch_operands = 0 : i64, tpu.core_type = #tpu.core_type<tc>, window_params = [{transform_indices = @transform_0, window_bounds = array<i64: 1, 16, 128>}, {pipeline_mode = #tpu.pipeline_mode<synchronous>, transform_indices = @transform_1, window_bounds = array<i64: 384, 128>}, {pipeline_mode = #tpu.pipeline_mode<synchronous>, transform_indices = @transform_2, window_bounds = array<i64: 1, 128>}, {pipeline_mode = #tpu.pipeline_mode<synchronous>, transform_indices = @transform_3, window_bounds = array<i64: 1, 128>}, {transform_indices = @transform_4, window_bounds = array<i64: 1, 14, 1>}, {transform_indices = @transform_5, window_bounds = array<i64: 1, 14, 128>}]} {
    %c0 = arith.constant 0 : index
    %c0_0 = arith.constant 0 : index
    %c0_1 = arith.constant 0 : index
    %0 = vector.load %arg1[%c0, %c0_0, %c0_1] : memref<1x16x128xf32, #tpu.memory_space<vmem>>, vector<1x14x128xf32>
    %1 = vector.shape_cast %0 : vector<1x14x128xf32> to vector<14x128xf32>
    %c0_2 = arith.constant 0 : index
    %c1 = arith.constant 1 : index
    %c0_3 = arith.constant 0 : index
    %2 = vector.load %arg1[%c0_2, %c1, %c0_3] : memref<1x16x128xf32, #tpu.memory_space<vmem>>, vector<1x14x128xf32>
    %3 = vector.shape_cast %2 : vector<1x14x128xf32> to vector<14x128xf32>
    %c0_4 = arith.constant 0 : index
    %c2 = arith.constant 2 : index
    %c0_5 = arith.constant 0 : index
    %4 = vector.load %arg1[%c0_4, %c2, %c0_5] : memref<1x16x128xf32, #tpu.memory_space<vmem>>, vector<1x14x128xf32>
    %5 = vector.shape_cast %4 : vector<1x14x128xf32> to vector<14x128xf32>
    %6 = tpu.concatenate %1, %3, %5 in 1 : vector<14x128xf32>, vector<14x128xf32>, vector<14x128xf32> -> vector<14x384xf32>
    %c0_6 = arith.constant 0 : index
    %c0_7 = arith.constant 0 : index
    %7 = vector.load %arg2[%c0_6, %c0_7] : memref<384x128xf32, #tpu.memory_space<vmem>>, vector<384x128xf32>
    %cst = arith.constant dense<0.000000e+00> : vector<14x128xf32>
    %8 = tpu.matmul %6, %7, %cst {dimension_numbers = #tpu.dot_dimension_numbers<[1], [0], [0], [1], [0, 0, 1, 1], [], []>} : vector<14x384xf32>, vector<384x128xf32>, vector<14x128xf32> -> vector<14x128xf32>
    %c0_8 = arith.constant 0 : index
    %c0_9 = arith.constant 0 : index
    %9 = vector.load %arg3[%c0_8, %c0_9] : memref<1x128xf32, #tpu.memory_space<vmem>>, vector<1x128xf32>
    %10 = vector.broadcast %9 : vector<1x128xf32> to vector<14x128xf32>
    %11 = arith.mulf %8, %10 : vector<14x128xf32>
    %c0_10 = arith.constant 0 : index
    %c0_11 = arith.constant 0 : index
    %12 = vector.load %arg4[%c0_10, %c0_11] : memref<1x128xf32, #tpu.memory_space<vmem>>, vector<1x128xf32>
    %13 = vector.broadcast %12 : vector<1x128xf32> to vector<14x128xf32>
    %14 = arith.addf %11, %13 : vector<14x128xf32>
    %cst_12 = arith.constant 0.000000e+00 : f32
    %15 = vector.broadcast %cst_12 : f32 to vector<14x128xf32>
    %16 = arith.maximumf %14, %15 : vector<14x128xf32>
    %c0_13 = arith.constant 0 : index
    %c0_14 = arith.constant 0 : index
    %c0_15 = arith.constant 0 : index
    %17 = vector.load %arg5[%c0_13, %c0_14, %c0_15] : memref<1x14x1xf32, #tpu.memory_space<vmem>>, vector<1x14x1xf32>
    %18 = vector.shape_cast %17 : vector<1x14x1xf32> to vector<14x1xf32>
    %19 = vector.broadcast %18 : vector<14x1xf32> to vector<14x128xf32>
    %20 = arith.mulf %16, %19 : vector<14x128xf32>
    %c0_16 = arith.constant 0 : index
    %c0_17 = arith.constant 0 : index
    %c0_18 = arith.constant 0 : index
    %21 = vector.load %arg6[%c0_16, %c0_17, %c0_18] : memref<1x14x128xf32, #tpu.memory_space<vmem>>, vector<1x14x128xf32>
    %22 = vector.shape_cast %21 : vector<1x14x128xf32> to vector<14x128xf32>
    %23 = vector.shape_cast %20 : vector<14x128xf32> to vector<1x14x128xf32>
    tpu.vector_store %arg6[%c0_16, %c0_17, %c0_18], %23 {strides = array<i32>} : memref<1x14x128xf32, #tpu.memory_space<vmem>>, vector<1x14x128xf32>,
    return
  }
  func.func @transform_0(%arg0: i32) -> (i32, i32, i32) {
    %c0_i32 = arith.constant 0 : i32
    %c0_i32_0 = arith.constant 0 : i32
    %c0_i32_1 = arith.constant 0 : i32
    return %arg0, %c0_i32, %c0_i32_0 : i32, i32, i32
  }
  func.func @transform_1(%arg0: i32) -> (i32, i32) {
    %c0_i32 = arith.constant 0 : i32
    %c0_i32_0 = arith.constant 0 : i32
    %c0_i32_1 = arith.constant 0 : i32
    return %c0_i32, %c0_i32_0 : i32, i32
  }
  func.func @transform_2(%arg0: i32) -> (i32, i32) {
    %c0_i32 = arith.constant 0 : i32
    %c0_i32_0 = arith.constant 0 : i32
    %c0_i32_1 = arith.constant 0 : i32
    return %c0_i32, %c0_i32_0 : i32, i32
  }
  func.func @transform_3(%arg0: i32) -> (i32, i32) {
    %c0_i32 = arith.constant 0 : i32
    %c0_i32_0 = arith.constant 0 : i32
    %c0_i32_1 = arith.constant 0 : i32
    return %c0_i32, %c0_i32_0 : i32, i32
  }
  func.func @transform_4(%arg0: i32) -> (i32, i32, i32) {
    %c0_i32 = arith.constant 0 : i32
    %c0_i32_0 = arith.constant 0 : i32
    %c0_i32_1 = arith.constant 0 : i32
    return %arg0, %c0_i32, %c0_i32_0 : i32, i32, i32
  }
  func.func @transform_5(%arg0: i32) -> (i32, i32, i32) {
    %c0_i32 = arith.constant 0 : i32
    %c0_i32_0 = arith.constant 0 : i32
    %c0_i32_1 = arith.constant 0 : i32
    return %arg0, %c0_i32, %c0_i32_0 : i32, i32, i32
  }
}

</mosaic_0001>

<bundles_post_ra>
// kernel: tpu_custom_call.1
= control target key start
LH: loop header
LB: loop body
LE: loop exit
PB: predicated region body
PF: predicated region fallthrough
CT: control target
= control target key end

     0   :  { %10 = vsyncpa [#allocation3], 0  ;;  %s851_s18 = smov 0   ;;  %s931_s0 = inlined_call_operand.vmem [shape: f32[2,16,128], index: 0, kind: input, shape index: {}]   ;;  %s932_s1 = inlined_call_operand.hbm [shape: f32[384,128], index: 1, kind: input, shape index: {}]   ;;  %s933_s2 = inlined_call_operand.vmem [shape: f32[1,128], index: 2, kind: input, shape index: {}]   ;;  %s934_s3 = inlined_call_operand.vmem [shape: f32[1,128], index: 3, kind: input, shape index: {}]   ;;  %s935_s4 = inlined_call_operand.vmem [shape: f32[2,14,1], index: 4, kind: input, shape index: {}]   ;;  %s936_s5 = inlined_call_operand.vmem [shape: f32[2,14,128], index: 5, kind: output, shape index: {}]  }
   0x1 LB: > { %s857_s19 = sadd.s32 4294967295, %s815_s18   ;;  %p581_p0 = scmp.ge.s32.totalorder %s815_s18, 1  ;;  %s815_s18 = sphi %s851_s18, %s16_s18  }
   0x2   : > { %p162_p1 = scmp.lt.s32.totalorder %s815_s18, 3  ;;  %s817_s20 = smov [#allocation2]  }
   0x3   : > { %s174_s21 = sshll.u32 %s817_s20, 4  ;;  %p937_p3 = scmp.eq.s32.totalorder %s857_s19, 0  ;;  %s175_s21 = int_to_ptr.vmem [resolvable:$true] %s174_s21 }
   0x4   : > { %p861_p2 = pnand %p581_p0, %p162_p1  ;;  %s777_s26 = scalar_lea.hbm %s932_s1, 6144 }
   0x5   : > { %p778_p6 = scmp.ne.s32.totalorder %s932_s1, %s777_s26  ;;  %p784_p10 = scmp.lt.u32.totalorder %s777_s26, %s932_s1 }
   0x6   : > { %s939_s22 = scalar_select %p861_p2, 1, 0 }
   0x7   : > { %p758_p4 = pneg %p861_p2 }
   0x9   : > { %p870_p5 = pnand %p937_p3, %p758_p4 }
   0xb   : > { %p779_p7 = pneg %p870_p5 }
   0xd   : > { %p780_p8 = pnand %p779_p7, %p778_p6 }
   0xf   : > { %p781_p9 = pneg %p780_p8 }
  0x11   : > { %p786_p11 = pnand %p784_p10, %p781_p9 }
  0x13   : > { %789 = shalt.err (!%p786_p11)
}
  0x14   : > { %s790_s6 = scalar_lea.vmem %s175_s21, 6144  ;;  %p798_p1 = scmp.lt.s32.totalorder %s175_s21, %s175_s21 }
  0x15   : > { %p791_p12 = scmp.ne.s32.totalorder %s175_s21, %s790_s6  ;;  %p799_p4 = scmp.lt.s32.totalorder %s790_s6, %s790_s6 }
  0x17   : > { %p793_p13 = pnand %p791_p12, %p779_p7  ;;  %p800_p3 = por %p799_p4, %p798_p1 }
  0x19   : > { %p794_p0 = pneg %p793_p13 }
  0x1b   : > { %p801_p2 = pnand %p800_p3, %p794_p0 }
  0x1d   : > { %804 = shalt.err (!%p801_p2)
}
  0x1e   : > { %s818_s7 = smov 128   ;;  %s819_s8 = smov 8  }
  0x1f   : > { %761 = dma.hbm_to_vmem [thread:$0]  (!%p870_p5), %s932_s1, 6144, %s175_s21, [#allocation3], %s818_s7, %s818_s7, %s819_s8  }
  0x20   : > { %p941_p6 = scmp.ne.s32.totalorder %s939_s22, 0 }
  0x21   : > { %p942_p8 = scmp.eq.s32.totalorder (!%p941_p6), %s857_s19, 0 }
  0x22   : > { %212 = sbr.rel (%p941_p6) target bundleno = 307 (0x133), region = 40 }
  0x29   : > { %810 = dma.done.wait (%p942_p8), [#allocation3], 6144   ;;  %p943_p7 = pmov %p942_p8 }
  0x2a   : > { %v820_v0 = vmov 0   ;;  %v282_v1 = vld [vmem:[#allocation2 + $0x80] sm:$0xff]  ;;  %v283_v2 = vld [vmem:[#allocation2 + $0x88] sm:$0xff]  ;;  %v284_v10 = vld [vmem:[#allocation2 + $0x90] sm:$0xff]  ;;  %p245_p2 = scmp.lt.s32.totalorder %s857_s19, 1 }
  0x2b   : > { %812 = vsyncadd (%p943_p7), [#allocation3], 4294961152  ;;  %776 = vset.pattern.permute.xlu0 %v820_v0  ;;  %v266_v3 = vld [vmem:[#allocation2] sm:$0xff]  ;;  %v690_v4 = vpack.c.bf16 %v283_v2, %v282_v1  ;;  %v267_v5 = vld [vmem:[#allocation2 + $0x8] sm:$0xff] }
  0x2c   : > { %v298_v6 = vld [vmem:[#allocation2 + $0x100] sm:$0xff]  ;;  %v299_v7 = vld [vmem:[#allocation2 + $0x108] sm:$0xff]  ;;  %v692_v8 = vpack.c.bf16 %v267_v5, %v266_v3  ;;  %v285_v11 = vld [vmem:[#allocation2 + $0x98] sm:$0xff]  ;;  %s945_s19 = smov (!%p245_p2, %s857_s19), 1 }
  0x2d   : > { %v722_v9 = vpack.c.bf16 %v299_v7, %v298_v6  ;;  %v268_v12 = vld [vmem:[#allocation2 + $0x10] sm:$0xff]  ;;  %691 = vmatprep.subr.bf16.mxu0 %v690_v4  ;;  %v694_v13 = vpack.c.bf16 %v285_v11, %v284_v10  ;;  %v269_v14 = vld [vmem:[#allocation2 + $0x18] sm:$0xff]  ;;  %v286_v19 = vld [vmem:[#allocation2 + $0xa0] sm:$0xff]  ;;  %s900_s11 = sshll.u32 %s945_s19, 4 }
  0x2e   : > { %v300_v15 = vld [vmem:[#allocation2 + $0x110] sm:$0xff]  ;;  %v301_v16 = vld [vmem:[#allocation2 + $0x118] sm:$0xff]  ;;  %693 = vmatpush3.bf16.msra.mxu0 %v692_v8  ;;  %v696_v17 = vpack.c.bf16 %v269_v14, %v268_v12  ;;  %v287_v20 = vld [vmem:[#allocation2 + $0xa8] sm:$0xff]  ;;  %s906_s14 = scalar_lea.vmem %s931_s0, %s900_s11  ;;  %s254_s17 = scalar_lea.vmem %s935_s4, %s900_s11 }
  0x2f   : > { %723 = vmatprep.subr.bf16.mxu1 %v722_v9  ;;  %v726_v18 = vpack.c.bf16 %v301_v16, %v300_v15  ;;  %v270_v21 = vld [vmem:[#allocation2 + $0x20] sm:$0xff]  ;;  %695 = vmatprep.subr.bf16.mxu0 %v694_v13  ;;  %v698_v22 = vpack.c.bf16 %v287_v20, %v286_v19  ;;  %v271_v23 = vld [vmem:[#allocation2 + $0x28] sm:$0xff]  ;;  %v288_v27 = vld [vmem:[#allocation2 + $0xb0] sm:$0xff]  ;;  %s259_s25 = scalar_lea.vmem %s936_s5, %s900_s11 }
  0x30   : > { %725 = vmatpush3.bf16.msra.mxu1 %v722_v9  ;;  %v302_v24 = vld [vmem:[#allocation2 + $0x120] sm:$0xff]  ;;  %v303_v25 = vld [vmem:[#allocation2 + $0x128] sm:$0xff]  ;;  %v289_v28 = vld [vmem:[#allocation2 + $0xb8] sm:$0xff]  ;;  %v700_v31 = vpack.c.bf16 %v271_v23, %v270_v21 }
  0x31   : > { %727 = vmatprep.subr.bf16.mxu1 %v726_v18  ;;  %v730_v26 = vpack.c.bf16 %v303_v25, %v302_v24  ;;  %v304_v29 = vld [vmem:[#allocation2 + $0x130] sm:$0xff]  ;;  %v305_v30 = vld [vmem:[#allocation2 + $0x138] sm:$0xff]  ;;  %v702_v32 = vpack.c.bf16 %v289_v28, %v288_v27  ;;  %v290_v36 = vld [vmem:[#allocation2 + $0xc0] sm:$0xff] }
  0x32   : > { %697 = vmatpush3.bf16.msra.mxu0 %v696_v17  ;;  %v272_v33 = vld [vmem:[#allocation2 + $0x30] sm:$0xff]  ;;  %v273_v34 = vld [vmem:[#allocation2 + $0x38] sm:$0xff]  ;;  %v734_v35 = vpack.c.bf16 %v305_v30, %v304_v29  ;;  %v291_v37 = vld [vmem:[#allocation2 + $0xc8] sm:$0xff] }
  0x33   : > { %699 = vmatprep.subr.bf16.mxu0 %v698_v22  ;;  %v306_v38 = vld [vmem:[#allocation2 + $0x140] sm:$0xff]  ;;  %v307_v39 = vld [vmem:[#allocation2 + $0x148] sm:$0xff]  ;;  %v704_v40 = vpack.c.bf16 %v273_v34, %v272_v33  ;;  %v706_v41 = vpack.c.bf16 %v291_v37, %v290_v36  ;;  %v292_v45 = vld [vmem:[#allocation2 + $0xd0] sm:$0xff] }
  0x34   : > { %729 = vmatpush3.bf16.msra.mxu1 %v726_v18  ;;  %v274_v42 = vld [vmem:[#allocation2 + $0x40] sm:$0xff]  ;;  %v275_v43 = vld [vmem:[#allocation2 + $0x48] sm:$0xff]  ;;  %v738_v44 = vpack.c.bf16 %v307_v39, %v306_v38  ;;  %v293_v46 = vld [vmem:[#allocation2 + $0xd8] sm:$0xff] }
  0x35   : > { %731 = vmatprep.subr.bf16.mxu1 %v730_v26  ;;  %v308_v47 = vld [vmem:[#allocation2 + $0x150] sm:$0xff]  ;;  %v309_v48 = vld [vmem:[#allocation2 + $0x158] sm:$0xff]  ;;  %v708_v49 = vpack.c.bf16 %v275_v43, %v274_v42  ;;  %v262_v50 = vld [vmem:[%s906_s14 + $0x1] sm:$0xff]  ;;  %v710_v52 = vpack.c.bf16 %v293_v46, %v292_v45 }
  0x36   : > { %701 = vmatpush3.bf16.msra.mxu0 %v700_v31  ;;  %v264_v51 = vld [vmem:[%s906_s14 + $0x2] sm:$0xff]  ;;  %v276_v53 = vld [vmem:[#allocation2 + $0x50] sm:$0xff]  ;;  %v277_v54 = vld [vmem:[#allocation2 + $0x58] sm:$0xff]  ;;  %v742_v55 = vpack.c.bf16 %v309_v48, %v308_v47  ;;  %378 = vmatprep.mubr.f32.mxu0 %v262_v50 }
  0x37   : > { %703 = vmatprep.subr.bf16.mxu0 %v702_v32  ;;  %v294_v56 = vld [vmem:[#allocation2 + $0xe0] sm:$0xff]  ;;  %v295_v57 = vld [vmem:[#allocation2 + $0xe8] sm:$0xff]  ;;  %687 = vmatprep.mubr.f32.mxu1 %v264_v51  ;;  %v712_v61 = vpack.c.bf16 %v277_v54, %v276_v53  ;;  %v296_v3 = vld [vmem:[#allocation2 + $0xf0] sm:$0xff] }
  0x38   : > { %733 = vmatpush3.bf16.msra.mxu1 %v730_v26  ;;  %v484_v58 = vld [vmem:[%s254_s17] sm:$0xff]  ;;  %v311_v60 = vld [vmem:[#allocation2 + $0x168] sm:$0xff]  ;;  %v714_v63 = vpack.c.bf16 %v295_v57, %v294_v56  ;;  %v297_v4 = vld [vmem:[#allocation2 + $0xf8] sm:$0xff] }
  0x39   : > { %735 = vmatprep.subr.bf16.mxu1 %v734_v35  ;;  %v310_v59 = vld [vmem:[#allocation2 + $0x160] sm:$0xff]  ;;  %488 = vperm.xlu0 %776, %v484_v58   ;;  %v485_v62 = vld [vmem:[%s254_s17 + $0x8] sm:$0x3f]  ;;  %v312_v5 = vld [vmem:[#allocation2 + $0x170] sm:$0xff]  ;;  %v718_v8 = vpack.c.bf16 %v297_v4, %v296_v3 }
  0x3a   : > { %705 = vmatpush3.bf16.msra.mxu0 %v704_v40  ;;  %v278_v0 = vld [vmem:[#allocation2 + $0x60] sm:$0xff]  ;;  %v279_v1 = vld [vmem:[#allocation2 + $0x68] sm:$0xff]  ;;  %v746_v2 = vpack.c.bf16 %v311_v60, %v310_v59  ;;  %v313_v6 = vld [vmem:[#allocation2 + $0x178] sm:$0xff] }
  0x3b   : > { %707 = vmatprep.subr.bf16.mxu0 %v706_v41  ;;  %v716_v7 = vpack.c.bf16 %v279_v1, %v278_v0  ;;  %v280_v9 = vld [vmem:[#allocation2 + $0x70] sm:$0xff]  ;;  %v281_v10 = vld [vmem:[#allocation2 + $0x78] sm:$0xff]  ;;  %v750_v11 = vpack.c.bf16 %v313_v6, %v312_v5  ;;  %v260_v13 = vld [vmem:[%s906_s14] sm:$0xff] }
  0x3c   : > { %737 = vmatpush3.bf16.msra.mxu1 %v734_v35  ;;  %v720_v12 = vpack.c.bf16 %v281_v10, %v280_v9  ;;  %v265_v14 = vld [vmem:[%s906_s14 + $0xa] sm:$0x3f]  ;;  %v592_v22 = vld [vmem:[%s933_s2] ss:$0 sm:$0xff] }
  0x3d   : > { %739 = vmatprep.subr.bf16.mxu1 %v738_v44  ;;  %493 = vperm.xlu0 %776, %v485_v62   ;;  %v263_v15 = vld [vmem:[%s906_s14 + $0x9] sm:$0x3f]  ;;  %v593_v26 = vld [vmem:[%s934_s3] ss:$0 sm:$0xff] }
  0x3e   : > { %709 = vmatpush3.bf16.msra.mxu0 %v708_v49  ;;  %v261_v16 = vld [vmem:[%s906_s14 + $0x8] sm:$0x3f] }
  0x3f   : > { %711 = vmatprep.subr.bf16.mxu0 %v710_v52 }
  0x40   : > { %741 = vmatpush3.bf16.msra.mxu1 %v738_v44 }
  0x41   : > { %743 = vmatprep.subr.bf16.mxu1 %v742_v55 }
  0x42   : > { %713 = vmatpush3.bf16.msra.mxu0 %v712_v61 }
  0x43   : > { %715 = vmatprep.subr.bf16.mxu0 %v714_v63 }
  0x44   : > { %745 = vmatpush3.bf16.msra.mxu1 %v742_v55 }
  0x45   : > { %747 = vmatprep.subr.bf16.mxu1 %v746_v2 }
  0x46   : > { %717 = vmatpush3.bf16.msra.mxu0 %v716_v7 }
  0x47   : > { %719 = vmatprep.subr.bf16.mxu0 %v718_v8 }
  0x48   : > { %749 = vmatpush3.bf16.msra.mxu1 %v746_v2 }
  0x49   : > { %751 = vmatprep.subr.bf16.mxu1 %v750_v11 }
  0x4a   : > { %721 = vmatpush3.bf16.msra.mxu0 %v720_v12 }
  0x4c   : > { %753 = vmatpush3.bf16.msra.mxu1 %v750_v11 }
  0x4d   : > { %379 = vmatmul.mubr.f32.vlgmr.msra.gmra.mrb[0].mxu0 %v260_v13 }
  0x4e   : > { %383 = vmatprep.mubr.f32.mxu0 %v263_v15 }
  0x4f   : > { %688 = vmatmul.mubr.f32.vlgmr.msra.gmra.mrb[0].mxu1 %v265_v14 }
  0x51   : > { %384 = vmatmul.mubr.f32.gmra.mrb[2].mxu0 %v261_v16 }
  0xb8   : > { %v489_v31 = vpop.permute.xlu0 %488 }
  0xbc   : > { %v494_v37 = vpop.permute.xlu0 %493 }
 0x120   : > { %v631_v17 = vpop.f32.mrb[0].mxu0 }
 0x121   : > { %v632_v18 = vpop.f32.mrb[1].mxu0 }
 0x122   : > { %v689_v19 = vpop.f32.mrb[0].mxu1  ;;  %v633_v20 = vadd.f32 %v632_v18, %v631_v17 }
 0x123   : > { %v455_v21 = vpop.f32.mrb[1].mxu1 }
 0x124   : > { %v456_v23 = vadd.f32 %v633_v20, %v455_v21  ;;  %v634_v24 = vpop.f32.mrb[2].mxu0 }
 0x125   : > { %v635_v25 = vpop.f32.mrb[3].mxu0 }
 0x126   : > { %v471_v27 = vmul.f32 %v592_v22, %v456_v23  ;;  %v636_v28 = vadd.f32 %v635_v25, %v634_v24 }
 0x128   : > { %v461_v29 = vadd.f32 %v689_v19, %v636_v28  ;;  %v480_v30 = vadd.f32 %v593_v26, %v471_v27 }
 0x12a   : > { %v472_v32 = vmul.f32 %v592_v22, %v461_v29  ;;  %v482_v33 = vmax.f32 %v480_v30, 0.0 }
 0x12c   : > { %v496_v34 = vmul.f32 %v489_v31, %v482_v33  ;;  %v481_v35 = vadd.f32 %v593_v26, %v472_v32 }
 0x12e   : > { %498 = vst [vmem:[%s259_s25] sm:$0xff] %v496_v34  ;;  %v483_v36 = vmax.f32 %v481_v35, 0.0 }
 0x130   : > { %v497_v38 = vmul.f32 %v494_v37, %v483_v36 }
 0x132   : > { %499 = vst [vmem:[%s259_s25 + $0x8] sm:$0x3f] %v497_v38 }
 0x133 PF: > { %s16_s18 = sadd.s32 1, %s815_s18  }
 0x134   : > { %p13_p3 = scmp.ge.s32.totalorder %s16_s18, 4  }
 0x136   :  { %15 = sbr.rel (!%p13_p3) target bundleno = 1 (0x1), region = 78 }
 0x13d   :  { %521 = vsyncpa [#allocation3], 1 }
 0x13e   :  { %523 = vsyncpa [#allocation3 + $0x1], 1 }

</bundles_post_ra>
